<compile_context>
chip_gen: v5e
topology: v5e:2x2
jax: 0.10.0
libtpu: 0.0.40
codegen_flags: <defaults>
</compile_context>

<pallas_src>
import jax
import jax.numpy as jnp
import numpy as np
from jax.experimental import pallas as pl
from jax.experimental.pallas import tpu as pltpu

_LANES = 128
_SUBLANES = 8
_TILE_ROWS = 1024                       # 1024 x 128 = 128K elements / operand / grid step
_SMALL_ELEMS = 2 * _TILE_ROWS * _LANES  # below this: gridless fast path


# --------------------------------------------------------------------------------------
# gridless fast path (small N): everything in VMEM, single invocation
# --------------------------------------------------------------------------------------
def _rank_loss_small_kernel(p0_ref, t0_ref, m_ref, p1_ref, t1_ref, out_ref):
    pred0 = p0_ref[...]                     # [R, 128] f32
    target0 = t0_ref[...]                   # [R, 128] f32
    mask = m_ref[...] != 0                  # [R, 128] int8 -> bool

    neg_big = jnp.float32(-1e30)
    p_shift = jnp.where(mask, pred0, neg_big)
    t_shift = jnp.where(mask, target0, neg_big)

    p_max = jnp.max(p_shift, axis=(0, 1), keepdims=True)   # (1,1)
    t_max = jnp.max(t_shift, axis=(0, 1), keepdims=True)   # (1,1)

    # masked-off lanes underflow to exactly 0 (no second select needed)
    p_exp = jnp.exp(p_shift - p_max)
    t_exp = jnp.exp(t_shift - t_max)

    p_sum = jnp.sum(p_exp, axis=(0, 1), keepdims=True)
    t_sum = jnp.sum(t_exp, axis=(0, 1), keepdims=True)
    a_sum = jnp.sum(t_exp * p_shift, axis=(0, 1), keepdims=True)

    # top_one = logsumexp(pred[mask]) - sum( softmax(target[mask]) * pred[mask] )
    # one (1,1) log + one exact (1,1) divide; no N-wide log / divide / reciprocal.
    top_one = p_max + jnp.log(p_sum) - a_sum / t_sum

    diff = p1_ref[...] - t1_ref[...]
    mse_ssl = jnp.sum(diff * diff, axis=(0, 1), keepdims=True) * jnp.float32(1.0 / diff.size)

    out_ref[...] = top_one + jnp.float32(0.8) * mse_ssl


# --------------------------------------------------------------------------------------
# tiled path (large N): 1-D grid over row tiles, online-softmax accumulators in VMEM scratch
# --------------------------------------------------------------------------------------
def _rank_loss_tiled_kernel(p0_ref, t0_ref, m_ref, p1_ref, t1_ref, out_ref,
                            m_p_ref, m_t_ref, psum_ref, tsum_ref, asum_ref):
    i = pl.program_id(0)

    @pl.when(i == 0)
    def _init():
        m_p_ref[...] = jnp.full((1, 1), -1e30, jnp.float32)
        m_t_ref[...] = jnp.full((1, 1), -1e30, jnp.float32)
        psum_ref[...] = jnp.zeros((1, 1), jnp.float32)
        tsum_ref[...] = jnp.zeros((1, 1), jnp.float32)
        asum_ref[...] = jnp.zeros((1, 1), jnp.float32)

    pred0 = p0_ref[...]                     # [TILE, 128] f32
    target0 = t0_ref[...]                   # [TILE, 128] f32
    mask = m_ref[...] != 0                  # [TILE, 128] int8 -> bool

    neg_big = jnp.float32(-1e30)
    p_shift = jnp.where(mask, pred0, neg_big)
    t_shift = jnp.where(mask, target0, neg_big)

    m_p_old = m_p_ref[...]
    m_t_old = m_t_ref[...]
    m_p_new = jnp.maximum(m_p_old, jnp.max(p_shift, axis=(0, 1), keepdims=True))
    m_t_new = jnp.maximum(m_t_old, jnp.max(t_shift, axis=(0, 1), keepdims=True))

    # rescale factors for running sums; exactly 0 while the old max is the -1e30 sentinel
    p_scale = jnp.exp(m_p_old - m_p_new)
    t_scale = jnp.exp(m_t_old - m_t_new)

    p_exp = jnp.exp(p_shift - m_p_new)      # masked-off lanes underflow to exactly 0
    t_exp = jnp.exp(t_shift - m_t_new)

    psum_ref[...] = psum_ref[...] * p_scale + jnp.sum(p_exp, axis=(0, 1), keepdims=True)
    tsum_ref[...] = tsum_ref[...] * t_scale + jnp.sum(t_exp, axis=(0, 1), keepdims=True)
    asum_ref[...] = asum_ref[...] * t_scale + jnp.sum(t_exp * p_shift, axis=(0, 1), keepdims=True)
    m_p_ref[...] = m_p_new
    m_t_ref[...] = m_t_new

    @pl.when(i == pl.num_programs(0) - 1)
    def _finalize():
        top_one = m_p_ref[...] + jnp.log(psum_ref[...]) - asum_ref[...] / tsum_ref[...]
        diff = p1_ref[...] - t1_ref[...]
        mse_ssl = jnp.sum(diff * diff, axis=(0, 1), keepdims=True) * jnp.float32(1.0 / diff.size)
        out_ref[...] = top_one + jnp.float32(0.8) * mse_ssl


# --------------------------------------------------------------------------------------
# wrapper
# --------------------------------------------------------------------------------------
def _pad_reshape(x, n_pad):
    pad = n_pad - x.shape[0]
    if pad:
        x = jnp.pad(x, (0, pad))            # padded tail has mask==0 -> contributes exactly 0
    return x.reshape(n_pad // _LANES, _LANES)


def rank_loss(pred, target, mask):
    """pred/target: tuples (head0, head1). head0 shape [N] (or [N,1]); head1 shape [B, D]."""
    pred0, pred1 = pred
    target0, target1 = target

    p0 = jnp.reshape(pred0, (-1,)).astype(jnp.float32)
    t0 = jnp.reshape(target0, (-1,)).astype(jnp.float32)
    m = jnp.reshape(mask, (-1,)).astype(jnp.int8)   # 1 byte/elem mask stream
    n = p0.shape[0]

    p1 = jnp.asarray(pred1, jnp.float32)
    t1 = jnp.asarray(target1, jnp.float32)
    if p1.ndim == 1:
        p1 = p1.reshape(1, -1)
        t1 = t1.reshape(1, -1)
    elif p1.ndim > 2:
        p1 = p1.reshape(-1, p1.shape[-1])
        t1 = t1.reshape(-1, t1.shape[-1])
    # TODO(synk): tile the head-1 MSE into the same grid if B*D ever becomes VMEM-sized.

    out_shape = jax.ShapeDtypeStruct((1, 1), jnp.float32)

    if n <= _SMALL_ELEMS:
        # gridless fast path: pad to full (8,128) vreg tiles
        chunk = _SUBLANES * _LANES
        n_pad = ((n + chunk - 1) // chunk) * chunk
        p0r = _pad_reshape(p0, n_pad)
        t0r = _pad_reshape(t0, n_pad)
        mr = _pad_reshape(m, n_pad)
        out = pl.pallas_call(
            _rank_loss_small_kernel,
            out_shape=out_shape,
            in_specs=[pl.BlockSpec(memory_space=pltpu.MemorySpace.VMEM)] * 5,
            out_specs=pl.BlockSpec(memory_space=pltpu.MemorySpace.VMEM),
        )(p0r, t0r, mr, p1, t1)
    else:
        # tiled / pipelined path: grid over row tiles, online-softmax accumulators
        chunk = _TILE_ROWS * _LANES
        n_pad = ((n + chunk - 1) // chunk) * chunk
        p0r = _pad_reshape(p0, n_pad)
        t0r = _pad_reshape(t0, n_pad)
        mr = _pad_reshape(m, n_pad)
        rows = n_pad // _LANES
        head0_spec = pl.BlockSpec((_TILE_ROWS, _LANES), lambda i: (i, 0))
        out = pl.pallas_call(
            _rank_loss_tiled_kernel,
            out_shape=out_shape,
            grid=(rows // _TILE_ROWS,),
            in_specs=[
                head0_spec,                                # pred0 tiles
                head0_spec,                                # target0 tiles
                head0_spec,                                # mask tiles (int8)
                pl.BlockSpec(p1.shape, lambda i: (0, 0)),  # head1: resident, fetched once
                pl.BlockSpec(t1.shape, lambda i: (0, 0)),
            ],
            out_specs=pl.BlockSpec((1, 1), lambda i: (0, 0)),
            scratch_shapes=[pltpu.VMEM((1, 1), jnp.float32)] * 5,
            compiler_params=pltpu.CompilerParams(
                dimension_semantics=("arbitrary",),        # reduction axis carries accumulators
            ),
        )(p0r, t0r, mr, p1, t1)
    return out[0, 0]


# --------------------------------------------------------------------------------------
# reference + test
# --------------------------------------------------------------------------------------
def _ref_rank_loss(pred, target, mask):
    """Independent NumPy reference mirroring the PyTorch code (true boolean gather)."""
    p0 = np.asarray(pred[0], np.float64).reshape(-1)
    t0 = np.asarray(target[0], np.float64).reshape(-1)
    m = np.asarray(mask).reshape(-1).astype(bool)
    pm, tm = p0[m], t0[m]

    def softmax(x):
        e = np.exp(x - x.max())
        return e / e.sum()

    pred_p = softmax(pm)
    target_p = softmax(tm)
    top_one = -np.sum(target_p * np.log(pred_p + 1e-9))
    mse_reg = np.mean((pm - tm) ** 2)
    p1 = np.asarray(pred[1], np.float64)
    t1 = np.asarray(target[1], np.float64)
    mse_ssl = np.mean((p1 - t1) ** 2)
    return 0.0 * mse_reg + top_one + 0.8 * mse_ssl


if __name__ == "__main__":
    # Module has no learnable parameters (__init__ is empty) -> nothing to initialize.
    key = jax.random.PRNGKey(0)

    # --- small shapes (gridless fast path), matching the module's expected inputs ---
    N, B, D = 128, 8, 128
    k0, k1, k2, k3, k4, k5, k6, k7 = jax.random.split(key, 8)
    pred0 = jax.random.normal(k0, (N,), dtype=jnp.float32)       # ranking scores head
    target0 = jax.random.normal(k1, (N,), dtype=jnp.float32)
    pred1 = jax.random.normal(k2, (B, D), dtype=jnp.float32)     # SSL head
    target1 = jax.random.normal(k3, (B, D), dtype=jnp.float32)
    mask = jax.random.bernoulli(k4, 0.5, (N,))
    mask = mask.at[0].set(True)                                  # ensure non-empty mask

    loss = rank_loss((pred0, pred1), (target0, target1), mask)
    loss = jax.block_until_ready(loss)
    ref = _ref_rank_loss((pred0, pred1), (target0, target1), mask)
    np.testing.assert_allclose(np.asarray(loss), ref, rtol=2e-3, atol=1e-4)

    # --- large N (tiled / pipelined path with padding + multiple grid steps) ---
    N_BIG = 2 * _TILE_ROWS * _LANES + 1000
    pred0_b = jax.random.normal(k5, (N_BIG,), dtype=jnp.float32)
    target0_b = jax.random.normal(k6, (N_BIG,), dtype=jnp.float32)
    mask_b = jax.random.bernoulli(k7, 0.5, (N_BIG,))
    mask_b = mask_b.at[0].set(True)

    loss_b = rank_loss((pred0_b, pred1), (target0_b, target1), mask_b)
    loss_b = jax.block_until_ready(loss_b)
    ref_b = _ref_rank_loss((pred0_b, pred1), (target0_b, target1), mask_b)
    np.testing.assert_allclose(np.asarray(loss_b), ref_b, rtol=2e-3, atol=1e-4)

    print("KERNEL_OK")
</pallas_src>

<mosaic_0001>
module attributes {stable_mosaic.version = 11 : i64} {
  func.func @_rank_loss_small_kernel(%arg0: memref<8x128xf32, #tpu.memory_space<vmem>>, %arg1: memref<8x128xf32, #tpu.memory_space<vmem>>, %arg2: memref<8x128xi8, #tpu.memory_space<vmem>>, %arg3: memref<8x128xf32, #tpu.memory_space<vmem>>, %arg4: memref<8x128xf32, #tpu.memory_space<vmem>>, %arg5: memref<1x1xf32, #tpu.memory_space<vmem>>) attributes {dimension_semantics = [], scalar_prefetch = 0 : i64, scratch_operands = 0 : i64, tpu.core_type = #tpu.core_type<tc>} {
    %c0 = arith.constant 0 : index
    %c0_0 = arith.constant 0 : index
    %0 = vector.load %arg0[%c0, %c0_0] : memref<8x128xf32, #tpu.memory_space<vmem>>, vector<8x128xf32>
    %c0_1 = arith.constant 0 : index
    %c0_2 = arith.constant 0 : index
    %1 = vector.load %arg1[%c0_1, %c0_2] : memref<8x128xf32, #tpu.memory_space<vmem>>, vector<8x128xf32>
    %c0_3 = arith.constant 0 : index
    %c0_4 = arith.constant 0 : index
    %2 = vector.load %arg2[%c0_3, %c0_4] : memref<8x128xi8, #tpu.memory_space<vmem>>, vector<8x128xi8>
    %c0_i8 = arith.constant 0 : i8
    %3 = vector.broadcast %c0_i8 : i8 to vector<8x128xi8>
    %4 = arith.cmpi ne, %2, %3 : vector<8x128xi8>
    %cst = arith.constant -1.000000e+30 : f32
    %5 = vector.broadcast %cst : f32 to vector<8x128xf32>
    %6 = arith.select %4, %0, %5 : vector<8x128xi1>, vector<8x128xf32>
    %cst_5 = arith.constant -1.000000e+30 : f32
    %7 = vector.broadcast %cst_5 : f32 to vector<8x128xf32>
    %8 = arith.select %4, %1, %7 : vector<8x128xi1>, vector<8x128xf32>
    %9 = vector.shape_cast %6 : vector<8x128xf32> to vector<1x8x128xf32>
    %cst_6 = arith.constant dense<0xFF800000> : vector<1xf32>
    %10 = vector.multi_reduction <maximumf>, %9, %cst_6 [1, 2] : vector<1x8x128xf32> to vector<1xf32>
    %11 = vector.shape_cast %10 : vector<1xf32> to vector<1x1x1xf32>
    %12 = vector.extract %11[0, 0, 0] : f32 from vector<1x1x1xf32>
    %13 = vector.broadcast %12 : f32 to vector<1x1xf32>
    %14 = vector.shape_cast %8 : vector<8x128xf32> to vector<1x8x128xf32>
    %cst_7 = arith.constant dense<0xFF800000> : vector<1xf32>
    %15 = vector.multi_reduction <maximumf>, %14, %cst_7 [1, 2] : vector<1x8x128xf32> to vector<1xf32>
    %16 = vector.shape_cast %15 : vector<1xf32> to vector<1x1x1xf32>
    %17 = vector.extract %16[0, 0, 0] : f32 from vector<1x1x1xf32>
    %18 = vector.broadcast %17 : f32 to vector<1x1xf32>
    %19 = vector.broadcast %13 : vector<1x1xf32> to vector<8x128xf32>
    %20 = arith.subf %6, %19 : vector<8x128xf32>
    %21 = math.exp %20 : vector<8x128xf32>
    %22 = vector.broadcast %18 : vector<1x1xf32> to vector<8x128xf32>
    %23 = arith.subf %8, %22 : vector<8x128xf32>
    %24 = math.exp %23 : vector<8x128xf32>
    %25 = vector.shape_cast %21 : vector<8x128xf32> to vector<1x8x128xf32>
    %cst_8 = arith.constant dense<0.000000e+00> : vector<1xf32>
    %26 = vector.multi_reduction <add>, %25, %cst_8 [1, 2] : vector<1x8x128xf32> to vector<1xf32>
    %27 = vector.shape_cast %26 : vector<1xf32> to vector<1x1x1xf32>
    %28 = vector.extract %27[0, 0, 0] : f32 from vector<1x1x1xf32>
    %29 = vector.broadcast %28 : f32 to vector<1x1xf32>
    %30 = vector.shape_cast %24 : vector<8x128xf32> to vector<1x8x128xf32>
    %cst_9 = arith.constant dense<0.000000e+00> : vector<1xf32>
    %31 = vector.multi_reduction <add>, %30, %cst_9 [1, 2] : vector<1x8x128xf32> to vector<1xf32>
    %32 = vector.shape_cast %31 : vector<1xf32> to vector<1x1x1xf32>
    %33 = vector.extract %32[0, 0, 0] : f32 from vector<1x1x1xf32>
    %34 = vector.broadcast %33 : f32 to vector<1x1xf32>
    %35 = arith.mulf %24, %6 : vector<8x128xf32>
    %36 = vector.shape_cast %35 : vector<8x128xf32> to vector<1x8x128xf32>
    %cst_10 = arith.constant dense<0.000000e+00> : vector<1xf32>
    %37 = vector.multi_reduction <add>, %36, %cst_10 [1, 2] : vector<1x8x128xf32> to vector<1xf32>
    %38 = vector.shape_cast %37 : vector<1xf32> to vector<1x1x1xf32>
    %39 = vector.extract %38[0, 0, 0] : f32 from vector<1x1x1xf32>
    %40 = vector.broadcast %39 : f32 to vector<1x1xf32>
    %41 = math.log %29 : vector<1x1xf32>
    %42 = arith.addf %13, %41 : vector<1x1xf32>
    %43 = arith.divf %40, %34 : vector<1x1xf32>
    %44 = arith.subf %42, %43 : vector<1x1xf32>
    %c0_11 = arith.constant 0 : index
    %c0_12 = arith.constant 0 : index
    %45 = vector.load %arg3[%c0_11, %c0_12] : memref<8x128xf32, #tpu.memory_space<vmem>>, vector<8x128xf32>
    %c0_13 = arith.constant 0 : index
    %c0_14 = arith.constant 0 : index
    %46 = vector.load %arg4[%c0_13, %c0_14] : memref<8x128xf32, #tpu.memory_space<vmem>>, vector<8x128xf32>
    %47 = arith.subf %45, %46 : vector<8x128xf32>
    %48 = arith.mulf %47, %47 : vector<8x128xf32>
    %49 = vector.shape_cast %48 : vector<8x128xf32> to vector<1x8x128xf32>
    %cst_15 = arith.constant dense<0.000000e+00> : vector<1xf32>
    %50 = vector.multi_reduction <add>, %49, %cst_15 [1, 2] : vector<1x8x128xf32> to vector<1xf32>
    %51 = vector.shape_cast %50 : vector<1xf32> to vector<1x1x1xf32>
    %52 = vector.extract %51[0, 0, 0] : f32 from vector<1x1x1xf32>
    %53 = vector.broadcast %52 : f32 to vector<1x1xf32>
    %cst_16 = arith.constant 9.765625E-4 : f32
    %54 = vector.broadcast %cst_16 : f32 to vector<1x1xf32>
    %55 = arith.mulf %53, %54 : vector<1x1xf32>
    %cst_17 = arith.constant 8.000000e-01 : f32
    %56 = vector.broadcast %cst_17 : f32 to vector<1x1xf32>
    %57 = arith.mulf %56, %55 : vector<1x1xf32>
    %58 = arith.addf %44, %57 : vector<1x1xf32>
    %c0_18 = arith.constant 0 : index
    %c0_19 = arith.constant 0 : index
    %59 = vector.load %arg5[%c0_18, %c0_19] : memref<1x1xf32, #tpu.memory_space<vmem>>, vector<1x1xf32>
    tpu.vector_store %arg5[%c0_18, %c0_19], %58 {strides = array<i32>} : memref<1x1xf32, #tpu.memory_space<vmem>>, vector<1x1xf32>,
    return
  }
}

</mosaic_0001>

<bundles_post_ra>
// kernel: tpu_custom_call.1
= control target key start
LH: loop header
LB: loop body
LE: loop exit
PB: predicated region body
PF: predicated region fallthrough
CT: control target
= control target key end

     0   :  { %10 = vsyncpa [#allocation3], 0  ;;  %s455_s0 = inlined_call_operand.hbm [shape: f32[8,128], index: 0, kind: input, shape index: {}]   ;;  %s456_s1 = inlined_call_operand.hbm [shape: f32[8,128], index: 1, kind: input, shape index: {}]   ;;  %s457_s2 = inlined_call_operand.hbm [shape: s8[8,128], index: 2, kind: input, shape index: {}]   ;;  %s458_s3 = inlined_call_operand.hbm [shape: f32[8,128], index: 3, kind: input, shape index: {}]   ;;  %s459_s4 = inlined_call_operand.hbm [shape: f32[8,128], index: 4, kind: input, shape index: {}]   ;;  %s460_s5 = inlined_call_operand.hbm [shape: f32[1,1], index: 5, kind: output, shape index: {}]  }
   0x1   :  { %11 = vsyncpa [#allocation6], 0 }
   0x2   :  { %12 = vsyncpa [#allocation9], 0  ;;  %s30_s20 = sshll.u32 %s456_s1, 4  ;;  %s31_s20 = int_to_ptr.hbm [resolvable:$true] %s30_s20 }
   0x3   :  { %13 = vsyncpa [#allocation4], 0  ;;  %s393_s21 = smov [#allocation5]   ;;  %s52_s25 = sshll.u32 %s458_s3, 4  ;;  %s53_s25 = int_to_ptr.hbm [resolvable:$true] %s52_s25 }
   0x4   :  { %s32_s22 = sshll.u32 %s393_s21, 4  ;;  %s394_s26 = smov [#allocation8]   ;;  %s33_s22 = int_to_ptr.vmem [resolvable:$true] %s32_s22 }
   0x5   :  { %35 = dma.hbm_to_vmem [thread:$0]  %s31_s20, 128, %s33_s22, [#allocation6]  }
   0x6   :  { %s54_s27 = sshll.u32 %s394_s26, 4  ;;  %s19_s30 = sshll.u32 %s455_s0, 4  ;;  %s55_s27 = int_to_ptr.vmem [resolvable:$true] %s54_s27  ;;  %s20_s30 = int_to_ptr.hbm [resolvable:$true] %s19_s30 }
   0x7   :  { %57 = dma.hbm_to_vmem [thread:$0]  %s53_s25, 128, %s55_s27, [#allocation9]  }
   0x8   :  { %s41_s7 = sshll.u32 %s457_s2, 4  ;;  %s395_s8 = smov [#allocation2]   ;;  %s42_s7 = int_to_ptr.hbm [resolvable:$true] %s41_s7 }
   0x9   :  { %s21_s9 = sshll.u32 %s395_s8, 4  ;;  %s396_s3 = smov [#allocation7]   ;;  %s22_s9 = int_to_ptr.vmem [resolvable:$true] %s21_s9 }
   0xa   :  { %24 = dma.hbm_to_vmem [thread:$0]  %s20_s30, 128, %s22_s9, [#allocation3]  }
   0xb   :  { %s43_s10 = sshll.u32 %s396_s3, 4  ;;  %s63_s13 = sshll.u32 %s459_s4, 4  ;;  %s44_s10 = int_to_ptr.vmem [resolvable:$true] %s43_s10  ;;  %s64_s13 = int_to_ptr.hbm [resolvable:$true] %s63_s13 }
   0xc   :  { %46 = dma.hbm_to_vmem [thread:$0]  %s42_s7, 32, %s44_s10, [#allocation6]  }
   0xd   :  { %s397_s0 = smov [#allocation10]  }
   0xe   :  { %s65_s14 = sshll.u32 %s397_s0, 4  ;;  %s66_s14 = int_to_ptr.vmem [resolvable:$true] %s65_s14 }
   0xf   :  { %68 = dma.hbm_to_vmem [thread:$0]  %s64_s13, 128, %s66_s14, [#allocation9]  }
  0x10   :  { %385 = dma.done.wait [#allocation3], 128  }
  0x11   :  { %386 = vsyncadd [#allocation3], 4294967168 }
  0x12   :  { %387 = dma.done.wait [#allocation6], 160  }
  0x13   :  { %388 = vsyncadd [#allocation6], 4294967136 }
  0x14   :  { %389 = dma.done.wait [#allocation9], 256  }
  0x15   :  { %390 = vsyncadd [#allocation9], 4294967040  ;;  %v93_v0 = vld [vmem:[#allocation7] sm:$0x3]  ;;  %v398_v1 = vmov 0   ;;  %v91_v3 = vld [vmem:[#allocation2] sm:$0xff] }
  0x16   :  { %vm94_vm0 = vnez %v93_v0  ;;  %v92_v6 = vld [vmem:[#allocation5] sm:$0xff]  ;;  %v176_v30 = vld [vmem:[#allocation8] sm:$0xff]  ;;  %v177_v31 = vld [vmem:[#allocation10] sm:$0xff]  ;;  %s399_s19 = smov [#allocation11]   ;;  %s202_s23 = sshll.u32 %s460_s5, 4  ;;  %vm193_vm6 = vcmask 0   ;;  %s203_s23 = int_to_ptr.hbm [resolvable:$true] %s202_s23 }
  0x17   :  { %v95_v2 = vsel %vm94_vm0, 16843009, %v398_v1  ;;  %v178_v33 = vsub.f32 %v176_v30, %v177_v31  ;;  %s200_s20 = sshll.u32 %s399_s19, 4  ;;  %s201_s20 = int_to_ptr.vmem [resolvable:$true] %s200_s20 }
  0x18   :  { %v96_v4 = vunpack.c.0.s8 %v95_v2 }
  0x19   :  { %v179_v34 = vmul.f32 %v178_v33, %v178_v33 }
  0x1a   :  { %vm97_vm1 = vcmp.ne.s32.totalorder %v96_v4, 0 }
  0x1b   :  { %v98_v5 = vsel %vm97_vm1, %v91_v3, -1e+30  ;;  %v99_v7 = vsel %vm97_vm1, %v92_v6, -1e+30 }
  0x1c   :  { %100 = vmax.xlane.f32.xlu0 %v98_v5 }
  0x24   :  { %110 = vmax.xlane.f32.xlu0 %v99_v7 }
  0x8f   :  { %v101_v8 = vpop.xlane.xlu0 %100 }
  0x90   :  { %v102_v9 = vrot.slane %v101_v8, 4 }
  0x92   :  { %v103_v10 = vmax.f32 %v101_v8, %v102_v9 }
  0x94   :  { %v104_v11 = vrot.slane %v103_v10, 2 }
  0x96   :  { %v105_v12 = vmax.f32 %v103_v10, %v104_v11 }
  0x97   :  { %v111_v13 = vpop.xlane.xlu0 %110 }
  0x98   :  { %v112_v14 = vrot.slane %v111_v13, 4  ;;  %v106_v15 = vrot.slane %v105_v12, 1 }
  0x9a   :  { %v113_v16 = vmax.f32 %v111_v13, %v112_v14  ;;  %v107_v17 = vmax.f32 %v105_v12, %v106_v15 }
  0x9c   :  { %v114_v18 = vrot.slane %v113_v16, 2  ;;  %214 = vpush %v107_v17 }
  0x9e   :  { %v115_v19 = vmax.f32 %v113_v16, %v114_v18 }
  0xa0   :  { %v116_v20 = vrot.slane %v115_v19, 1 }
  0xa2   :  { %v117_v21 = vmax.f32 %v115_v19, %v116_v20 }
  0xa4   :  { %216 = vpush %v117_v21 }
  0xcd   :  { %s445_s2 = spop %214 }
  0xce   :  { %v109_v22 = vstv %s445_s2 }
  0xcf   :  { %v119_v23 = vsub.f32 %v98_v5, %v109_v22 }
  0xd1   :  { %v120_v24 = vmul.f32 1.442695, %v119_v23 }
  0xd3   :  { %233 = vpow2.f32 %v120_v24 }
  0xd5   :  { %s217_s4 = spop %216 }
  0xd6   :  { %v122_v25 = vstv %s217_s4 }
  0xd7   :  { %v123_v26 = vsub.f32 %v99_v7, %v122_v25 }
  0xd9   :  { %v234_v27 = vpop.eup %233  ;;  %v124_v28 = vmul.f32 1.442695, %v123_v26 }
  0xda   :  { %126 = vadd.xlane.f32.xlu1 %v234_v27 }
  0xdb   :  { %235 = vpow2.f32 %v124_v28 }
  0xe1   :  { %v236_v29 = vpop.eup %235 }
  0xe2   :  { %136 = vadd.xlane.f32.xlu1 %v236_v29  ;;  %v146_v32 = vmul.f32 %v236_v29, %v98_v5 }
  0xe4   :  { %147 = vadd.xlane.f32.xlu2 %v146_v32 }
  0xec   :  { %180 = vadd.xlane.f32.xlu2 %v179_v34 }
 0x14d   :  { %v127_v35 = vpop.xlane.xlu1 %126 }
 0x14e   :  { %v128_v36 = vrot.slane %v127_v35, 4 }
 0x150   :  { %v129_v37 = vadd.f32 %v128_v36, %v127_v35 }
 0x152   :  { %v130_v38 = vrot.slane %v129_v37, 2 }
 0x154   :  { %v131_v39 = vadd.f32 %v130_v38, %v129_v37 }
 0x155   :  { %v137_v40 = vpop.xlane.xlu1 %136 }
 0x156   :  { %v138_v41 = vrot.slane %v137_v40, 4  ;;  %v132_v42 = vrot.slane %v131_v39, 1 }
 0x157   :  { %v148_v43 = vpop.xlane.xlu2 %147 }
 0x158   :  { %v139_v44 = vadd.f32 %v138_v41, %v137_v40  ;;  %v149_v45 = vrot.slane %v148_v43, 4  ;;  %v133_v46 = vadd.f32 %v132_v42, %v131_v39 }
 0x15a   :  { %v140_v47 = vrot.slane %v139_v44, 2  ;;  %v150_v48 = vadd.f32 %v149_v45, %v148_v43  ;;  %218 = vpush %v133_v46 }
 0x15c   :  { %v141_v49 = vadd.f32 %v140_v47, %v139_v44  ;;  %v151_v50 = vrot.slane %v150_v48, 2 }
 0x15e   :  { %v142_v51 = vrot.slane %v141_v49, 1  ;;  %v152_v52 = vadd.f32 %v151_v50, %v150_v48 }
 0x15f   :  { %v181_v53 = vpop.xlane.xlu2 %180 }
 0x160   :  { %v182_v54 = vrot.slane %v181_v53, 4  ;;  %v143_v55 = vadd.f32 %v142_v51, %v141_v49  ;;  %v153_v56 = vrot.slane %v152_v52, 1 }
 0x162   :  { %v183_v57 = vadd.f32 %v182_v54, %v181_v53  ;;  %220 = vpush %v143_v55  ;;  %v154_v58 = vadd.f32 %v153_v56, %v152_v52 }
 0x164   :  { %v184_v59 = vrot.slane %v183_v57, 2  ;;  %222 = vpush %v154_v58 }
 0x166   :  { %v185_v60 = vadd.f32 %v184_v59, %v183_v57 }
 0x168   :  { %v186_v61 = vrot.slane %v185_v60, 1 }
 0x16a   :  { %v187_v62 = vadd.f32 %v186_v61, %v185_v60 }
 0x16c   :  { %224 = vpush %v187_v62 }
 0x18b   :  { %s219_s15 = spop %218 }
 0x18c   :  { %v135_v0 = vstv %s219_s15 }
 0x193   :  { %s221_s16 = spop %220 }
 0x194   :  { %v145_v63 = vstv %s221_s16 }
 0x195   :  { %237 = vrcp.f32 %v145_v63  ;;  %s223_s17 = spop %222  ;;  %v171_v5 = vand.u32 2147483648, %v145_v63  ;;  %v169_v7 = vand.u32 2147483647, %v145_v63  ;;  %vm165_vm3 = vweird.f32 %v145_v63 }
 0x196   :  { %239 = vlog2.f32 %v135_v0  ;;  %v156_v14 = vstv %s223_s17 }
 0x197   :  { %v172_v11 = vor.u32 1.1754944e-38, %v171_v5  ;;  %vm170_vm5 = vcmp.eq.f32.partialorder %v169_v7, 8.507059e+37 }
 0x19b   :  { %v238_v1 = vpop.eup %237 }
 0x19c   :  { %v161_v2 = vmul.f32 %v238_v1, %v145_v63  ;;  %v240_v4 = vpop.eup %239  ;;  %vm166_vm2 = vweird.f32 %v238_v1 }
 0x19d   :  { %s225_s18 = spop %224  ;;  %v158_v9 = vmul.f32 0.6931472, %v240_v4  ;;  %vm167_vm4 = vmor %vm165_vm3, %vm166_vm2 }
 0x19e   :  { %v162_v3 = vsub.f32 1.0, %v161_v2  ;;  %v189_v8 = vstv %s225_s18 }
 0x19f   :  { %v190_v13 = vmul.f32 0.0009765625, %v189_v8  ;;  %v159_v16 = vadd.f32 %v158_v9, %v109_v22 }
 0x1a0   :  { %v163_v6 = vmul.f32 %v238_v1, %v162_v3 }
 0x1a1   :  { %v191_v19 = vmul.f32 0.8, %v190_v13 }
 0x1a2   :  { %v164_v10 = vadd.f32 %v238_v1, %v163_v6 }
 0x1a4   :  { %v168_v12 = vsel %vm167_vm4, %v238_v1, %v164_v10 }
 0x1a5   :  { %v173_v15 = vsel %vm170_vm5, %v172_v11, %v168_v12 }
 0x1a6   :  { %v174_v17 = vmul.f32 %v173_v15, %v156_v14 }
 0x1a8   :  { %v175_v18 = vsub.f32 %v159_v16, %v174_v17 }
 0x1aa   :  { %v192_v20 = vadd.f32 %v191_v19, %v175_v18 }
 0x1ac   :  { %194 = vst.msk [vmem:[#allocation11] sm:$0x1] %vm193_vm6, %v192_v20 }
 0x1ad   :  { %205 = dma.vmem_to_hbm [thread:$0]  %s201_s20, 16, %s203_s23, [#allocation4]  }
 0x1ae   :  { %391 = dma.done.wait [#allocation4], 16  }
 0x1af   :  { %392 = vsyncadd [#allocation4], 4294967280 }
 0x1b0   :  { %210 = vsyncpa [#allocation3], 1 }
 0x1b1   :  { %211 = vsyncpa [#allocation6], 1 }
 0x1b2   :  { %212 = vsyncpa [#allocation9], 1 }
 0x1b3   :  { %213 = vsyncpa [#allocation4], 1 }

</bundles_post_ra>
